<compile_context>
chip_gen: v7x
topology: tpu7x:2x2x1
jax: 0.10.0
libtpu: 0.0.40
codegen_flags: <defaults>
</compile_context>

<pallas_src>
import functools
import math

import jax
import jax.numpy as jnp
from jax.experimental import pallas as pl
from jax.experimental.pallas import tpu as pltpu


_EPS = 1e-5
_LANE = 128    # lane-dense padding for hidden / output feature dims
_SUBLANE = 8   # sublane padding for the layer-1 contraction dim (f32)


def _mlp_kernel(x_ref, w1_ref, w2_ref, w3_ref, w4_ref, b4_ref, o_ref):
    """One independent evaluation (batch of N rows), fully VMEM-resident.

    x_ref : (N, D_in_pad)       f32
    wK_ref: (in_pad, out_pad)   f32 or bf16 (MXU-boundary dtype)
    b4_ref: (1, D_out_pad)      f32
    o_ref : (N, D_out_pad)      f32
    """
    w_dtype = w1_ref.dtype

    def dot(a, w_ref):
        # Cast activations to the weight dtype at the MXU boundary; accumulate
        # in f32 regardless.
        return jnp.dot(a.astype(w_dtype), w_ref[...],
                       preferred_element_type=jnp.float32)

    def bn_tanh(h):
        # BatchNorm1d, training mode (biased variance over the batch axis,
        # gamma=1, beta=0).  var = E[h^2] - mu^2 lets both sublane reductions
        # issue back-to-back on the XLU.  Padded all-zero feature lanes stay
        # exactly zero: mu=0, var=0, 0*rsqrt(eps)=0, tanh(0)=0.
        mu = jnp.mean(h, axis=0, keepdims=True)
        var = jnp.maximum(jnp.mean(h * h, axis=0, keepdims=True) - mu * mu, 0.0)
        return jnp.tanh((h - mu) * jax.lax.rsqrt(var + _EPS))

    x = x_ref[...]

    # b1/b2/b3 are mathematically dead under no-affine batch-statistic BN and
    # are therefore not loaded or added.
    h = bn_tanh(dot(x, w1_ref))
    h = bn_tanh(dot(h, w2_ref))
    h = bn_tanh(dot(h, w3_ref))

    o = dot(h, w4_ref) + b4_ref[...]
    o_ref[...] = o.astype(o_ref.dtype)


@functools.partial(jax.jit, static_argnames=("out_size",))
def mlp_forward_stacked(x_stacked, padded_params, out_size):
    """Run E independent MLP evaluations under one pallas_call.

    x_stacked: (E, N, D_in).  BN statistics are per (N, D) evaluation block,
    matching E independent calls of the PyTorch module in training mode.
    """
    e, n, d_in = x_stacked.shape
    w1 = padded_params["w1"]
    w2 = padded_params["w2"]
    w3 = padded_params["w3"]
    w4 = padded_params["w4"]
    b4 = padded_params["b4"]

    d_in_pad = w1.shape[0]
    h_pad = w1.shape[1]
    out_pad = w4.shape[1]

    # Pad the layer-1 contraction dim (zeros are inert against zero-padded w1 rows).
    if d_in_pad != d_in:
        x_stacked = jnp.pad(x_stacked, ((0, 0), (0, 0), (0, d_in_pad - d_in)))

    w_bytes = w1.dtype.itemsize
    cost = pl.CostEstimate(
        flops=2 * e * n * (d_in_pad * h_pad + 2 * h_pad * h_pad + h_pad * out_pad),
        transcendentals=3 * e * n * h_pad,
        bytes_accessed=(4 * (e * n * d_in_pad + e * n * out_pad + out_pad)
                        + w_bytes * (d_in_pad * h_pad + 2 * h_pad * h_pad
                                     + h_pad * out_pad)),
    )

    out_padded = pl.pallas_call(
        _mlp_kernel,
        out_shape=jax.ShapeDtypeStruct((e, n, out_pad), jnp.float32),
        grid=(e,),
        in_specs=[
            # Per-evaluation activation tile.
            pl.BlockSpec((None, n, d_in_pad), lambda i: (i, 0, 0)),
            # Weights: constant index_map -> DMA'd once, VMEM-resident across grid.
            pl.BlockSpec((d_in_pad, h_pad), lambda i: (0, 0)),
            pl.BlockSpec((h_pad, h_pad), lambda i: (0, 0)),
            pl.BlockSpec((h_pad, h_pad), lambda i: (0, 0)),
            pl.BlockSpec((h_pad, out_pad), lambda i: (0, 0)),
            pl.BlockSpec((1, out_pad), lambda i: (0, 0)),
        ],
        out_specs=pl.BlockSpec((None, n, out_pad), lambda i: (i, 0, 0)),
        compiler_params=pltpu.CompilerParams(
            dimension_semantics=("parallel",)),  # megacore sharding on v7x
        cost_estimate=cost,
    )(x_stacked, w1, w2, w3, w4, b4)

    # Padded output lanes are exactly zero; slice back to the true width
    # outside the kernel so the kernel store stays lane-dense / unmasked.
    return out_padded[:, :, :out_size]


def mlp_forward(x, padded_params, out_size):
    """Single-batch forward: x (N, D_in) -> (N, out_size)."""
    return mlp_forward_stacked(x[None], padded_params, out_size)[0]


def _xavier_uniform(key, fan_out, fan_in, dtype=jnp.float32):
    # Matches torch.nn.init.xavier_uniform_ on a (fan_out, fan_in) weight.
    bound = math.sqrt(6.0 / (fan_in + fan_out))
    return jax.random.uniform(key, (fan_out, fan_in), dtype=dtype,
                              minval=-bound, maxval=bound)


def init_params(key, input_size, hidden_size, output_size):
    """Unpadded params matching the PyTorch module (weights stored (in, out))."""
    k1, k2, k3, k4 = jax.random.split(key, 4)
    w1 = _xavier_uniform(k1, hidden_size, input_size).T
    w2 = _xavier_uniform(k2, hidden_size, hidden_size).T
    w3 = _xavier_uniform(k3, hidden_size, hidden_size).T
    w4 = _xavier_uniform(k4, output_size, hidden_size).T
    return {
        "w1": w1, "b1": jnp.zeros((1, hidden_size), jnp.float32),
        "w2": w2, "b2": jnp.zeros((1, hidden_size), jnp.float32),
        "w3": w3, "b3": jnp.zeros((1, hidden_size), jnp.float32),
        "w4": w4, "b4": jnp.zeros((1, output_size), jnp.float32),
    }


def _pad_axis(a, axis, mult):
    pad = (-a.shape[axis]) % mult
    if pad == 0:
        return a
    widths = [(0, 0)] * a.ndim
    widths[axis] = (0, pad)
    return jnp.pad(a, widths)


def pad_params(params, weight_dtype=jnp.float32):
    """Zero-pad feature dims (lane=128, layer-1 contraction=8) once; optionally
    cast weights to bf16 for the MXU boundary (accumulation stays f32)."""
    w1 = _pad_axis(_pad_axis(params["w1"], 0, _SUBLANE), 1, _LANE)
    w2 = _pad_axis(_pad_axis(params["w2"], 0, _LANE), 1, _LANE)
    w3 = _pad_axis(_pad_axis(params["w3"], 0, _LANE), 1, _LANE)
    w4 = _pad_axis(_pad_axis(params["w4"], 0, _LANE), 1, _LANE)
    b4 = _pad_axis(params["b4"], 1, _LANE)
    return {
        "w1": w1.astype(weight_dtype),
        "w2": w2.astype(weight_dtype),
        "w3": w3.astype(weight_dtype),
        "w4": w4.astype(weight_dtype),
        "b4": b4,  # bias added post-matmul in f32
    }


def reference_forward(x, params):
    """Pure-JAX f32 reference, faithful to the PyTorch module (all biases)."""
    def bn_tanh(h):
        mu = jnp.mean(h, axis=0, keepdims=True)
        var = jnp.mean((h - mu) ** 2, axis=0, keepdims=True)
        return jnp.tanh((h - mu) / jnp.sqrt(var + _EPS))

    h = bn_tanh(x @ params["w1"] + params["b1"])
    h = bn_tanh(h @ params["w2"] + params["b2"])
    h = bn_tanh(h @ params["w3"] + params["b3"])
    return h @ params["w4"] + params["b4"]


if __name__ == "__main__":
    key = jax.random.PRNGKey(0)
    k_x, k_xs, k_p = jax.random.split(key, 3)

    batch = 8
    input_size = 4
    hidden_size = 32
    output_size = 3
    n_evals = 16  # independent evaluations stacked onto the grid

    params = init_params(k_p, input_size, hidden_size, output_size)

    # ---- f32 path: single batch (grid of 1) ------------------------------
    padded_f32 = pad_params(params, weight_dtype=jnp.float32)
    x = jax.random.normal(k_x, (batch, input_size), dtype=jnp.float32)

    out = jax.block_until_ready(mlp_forward(x, padded_f32, output_size))
    ref = reference_forward(x, params)
    assert out.shape == (batch, output_size)
    assert jnp.allclose(out, ref, atol=1e-5, rtol=1e-5), "single-batch mismatch"

    # ---- f32 path: stacked evaluations (amortized launch, per-block BN) --
    xs = jax.random.normal(k_xs, (n_evals, batch, input_size), dtype=jnp.float32)
    outs = jax.block_until_ready(mlp_forward_stacked(xs, padded_f32, output_size))
    refs = jax.vmap(reference_forward, in_axes=(0, None))(xs, params)
    assert outs.shape == (n_evals, batch, output_size)
    assert jnp.allclose(outs, refs, atol=1e-5, rtol=1e-5), "stacked mismatch"

    # ---- bf16-weight path (MXU-boundary cast, f32 accumulation) ----------
    padded_bf16 = pad_params(params, weight_dtype=jnp.bfloat16)
    outs_bf16 = jax.block_until_ready(
        mlp_forward_stacked(xs, padded_bf16, output_size))
    assert outs_bf16.shape == (n_evals, batch, output_size)
    assert bool(jnp.all(jnp.isfinite(outs_bf16))), "bf16 path produced non-finite"
    assert jnp.allclose(outs_bf16, refs, atol=1.5e-1), "bf16 path far from reference"

    print("KERNEL_OK")
</pallas_src>

<mosaic_0001>
module attributes {stable_mosaic.version = 11 : i64} {
  func.func @_mlp_kernel(%arg0: i32, %arg1: memref<1x8x8xf32, #tpu.memory_space<vmem>>, %arg2: memref<8x128xf32, #tpu.memory_space<vmem>>, %arg3: memref<128x128xf32, #tpu.memory_space<vmem>>, %arg4: memref<128x128xf32, #tpu.memory_space<vmem>>, %arg5: memref<128x128xf32, #tpu.memory_space<vmem>>, %arg6: memref<1x128xf32, #tpu.memory_space<vmem>>, %arg7: memref<1x8x128xf32, #tpu.memory_space<vmem>>) attributes {dimension_semantics = [#tpu.dimension_semantics<parallel>], iteration_bounds = array<i64: 1>, scalar_prefetch = 0 : i64, scratch_operands = 0 : i64, tpu.core_type = #tpu.core_type<tc>, window_params = [{transform_indices = @transform_0, window_bounds = array<i64: 1, 8, 8>}, {pipeline_mode = #tpu.pipeline_mode<synchronous>, transform_indices = @transform_1, window_bounds = array<i64: 8, 128>}, {pipeline_mode = #tpu.pipeline_mode<synchronous>, transform_indices = @transform_2, window_bounds = array<i64: 128, 128>}, {pipeline_mode = #tpu.pipeline_mode<synchronous>, transform_indices = @transform_3, window_bounds = array<i64: 128, 128>}, {pipeline_mode = #tpu.pipeline_mode<synchronous>, transform_indices = @transform_4, window_bounds = array<i64: 128, 128>}, {pipeline_mode = #tpu.pipeline_mode<synchronous>, transform_indices = @transform_5, window_bounds = array<i64: 1, 128>}, {transform_indices = @transform_6, window_bounds = array<i64: 1, 8, 128>}]} {
    %c0 = arith.constant 0 : index
    %c0_0 = arith.constant 0 : index
    %c0_1 = arith.constant 0 : index
    %0 = vector.load %arg1[%c0, %c0_0, %c0_1] : memref<1x8x8xf32, #tpu.memory_space<vmem>>, vector<1x8x8xf32>
    %1 = vector.shape_cast %0 : vector<1x8x8xf32> to vector<8x8xf32>
    %c0_2 = arith.constant 0 : index
    %c0_3 = arith.constant 0 : index
    %2 = vector.load %arg2[%c0_2, %c0_3] : memref<8x128xf32, #tpu.memory_space<vmem>>, vector<8x128xf32>
    %cst = arith.constant dense<0.000000e+00> : vector<8x128xf32>
    %3 = tpu.matmul %1, %2, %cst {dimension_numbers = #tpu.dot_dimension_numbers<[1], [0], [0], [1], [0, 0, 1, 1], [], []>} : vector<8x8xf32>, vector<8x128xf32>, vector<8x128xf32> -> vector<8x128xf32>
    %cst_4 = arith.constant dense<0.000000e+00> : vector<128xf32>
    %4 = vector.multi_reduction <add>, %3, %cst_4 [0] : vector<8x128xf32> to vector<128xf32>
    %5 = vector.shape_cast %4 : vector<128xf32> to vector<1x128xf32>
    %cst_5 = arith.constant 8.000000e+00 : f32
    %6 = vector.broadcast %cst_5 : f32 to vector<1x128xf32>
    %7 = arith.divf %5, %6 : vector<1x128xf32>
    %8 = arith.mulf %3, %3 : vector<8x128xf32>
    %cst_6 = arith.constant dense<0.000000e+00> : vector<128xf32>
    %9 = vector.multi_reduction <add>, %8, %cst_6 [0] : vector<8x128xf32> to vector<128xf32>
    %10 = vector.shape_cast %9 : vector<128xf32> to vector<1x128xf32>
    %cst_7 = arith.constant 8.000000e+00 : f32
    %11 = vector.broadcast %cst_7 : f32 to vector<1x128xf32>
    %12 = arith.divf %10, %11 : vector<1x128xf32>
    %13 = arith.mulf %7, %7 : vector<1x128xf32>
    %14 = arith.subf %12, %13 : vector<1x128xf32>
    %cst_8 = arith.constant 0.000000e+00 : f32
    %15 = vector.broadcast %cst_8 : f32 to vector<1x128xf32>
    %16 = arith.maximumf %14, %15 : vector<1x128xf32>
    %17 = vector.broadcast %7 : vector<1x128xf32> to vector<8x128xf32>
    %18 = arith.subf %3, %17 : vector<8x128xf32>
    %cst_9 = arith.constant 9.99999974E-6 : f32
    %19 = vector.broadcast %cst_9 : f32 to vector<1x128xf32>
    %20 = arith.addf %16, %19 : vector<1x128xf32>
    %21 = math.rsqrt %20 : vector<1x128xf32>
    %22 = vector.broadcast %21 : vector<1x128xf32> to vector<8x128xf32>
    %23 = arith.mulf %18, %22 : vector<8x128xf32>
    %24 = math.tanh %23 : vector<8x128xf32>
    %c0_10 = arith.constant 0 : index
    %c0_11 = arith.constant 0 : index
    %25 = vector.load %arg3[%c0_10, %c0_11] : memref<128x128xf32, #tpu.memory_space<vmem>>, vector<128x128xf32>
    %cst_12 = arith.constant dense<0.000000e+00> : vector<8x128xf32>
    %26 = tpu.matmul %24, %25, %cst_12 {dimension_numbers = #tpu.dot_dimension_numbers<[1], [0], [0], [1], [0, 0, 1, 1], [], []>} : vector<8x128xf32>, vector<128x128xf32>, vector<8x128xf32> -> vector<8x128xf32>
    %cst_13 = arith.constant dense<0.000000e+00> : vector<128xf32>
    %27 = vector.multi_reduction <add>, %26, %cst_13 [0] : vector<8x128xf32> to vector<128xf32>
    %28 = vector.shape_cast %27 : vector<128xf32> to vector<1x128xf32>
    %cst_14 = arith.constant 8.000000e+00 : f32
    %29 = vector.broadcast %cst_14 : f32 to vector<1x128xf32>
    %30 = arith.divf %28, %29 : vector<1x128xf32>
    %31 = arith.mulf %26, %26 : vector<8x128xf32>
    %cst_15 = arith.constant dense<0.000000e+00> : vector<128xf32>
    %32 = vector.multi_reduction <add>, %31, %cst_15 [0] : vector<8x128xf32> to vector<128xf32>
    %33 = vector.shape_cast %32 : vector<128xf32> to vector<1x128xf32>
    %cst_16 = arith.constant 8.000000e+00 : f32
    %34 = vector.broadcast %cst_16 : f32 to vector<1x128xf32>
    %35 = arith.divf %33, %34 : vector<1x128xf32>
    %36 = arith.mulf %30, %30 : vector<1x128xf32>
    %37 = arith.subf %35, %36 : vector<1x128xf32>
    %cst_17 = arith.constant 0.000000e+00 : f32
    %38 = vector.broadcast %cst_17 : f32 to vector<1x128xf32>
    %39 = arith.maximumf %37, %38 : vector<1x128xf32>
    %40 = vector.broadcast %30 : vector<1x128xf32> to vector<8x128xf32>
    %41 = arith.subf %26, %40 : vector<8x128xf32>
    %cst_18 = arith.constant 9.99999974E-6 : f32
    %42 = vector.broadcast %cst_18 : f32 to vector<1x128xf32>
    %43 = arith.addf %39, %42 : vector<1x128xf32>
    %44 = math.rsqrt %43 : vector<1x128xf32>
    %45 = vector.broadcast %44 : vector<1x128xf32> to vector<8x128xf32>
    %46 = arith.mulf %41, %45 : vector<8x128xf32>
    %47 = math.tanh %46 : vector<8x128xf32>
    %c0_19 = arith.constant 0 : index
    %c0_20 = arith.constant 0 : index
    %48 = vector.load %arg4[%c0_19, %c0_20] : memref<128x128xf32, #tpu.memory_space<vmem>>, vector<128x128xf32>
    %cst_21 = arith.constant dense<0.000000e+00> : vector<8x128xf32>
    %49 = tpu.matmul %47, %48, %cst_21 {dimension_numbers = #tpu.dot_dimension_numbers<[1], [0], [0], [1], [0, 0, 1, 1], [], []>} : vector<8x128xf32>, vector<128x128xf32>, vector<8x128xf32> -> vector<8x128xf32>
    %cst_22 = arith.constant dense<0.000000e+00> : vector<128xf32>
    %50 = vector.multi_reduction <add>, %49, %cst_22 [0] : vector<8x128xf32> to vector<128xf32>
    %51 = vector.shape_cast %50 : vector<128xf32> to vector<1x128xf32>
    %cst_23 = arith.constant 8.000000e+00 : f32
    %52 = vector.broadcast %cst_23 : f32 to vector<1x128xf32>
    %53 = arith.divf %51, %52 : vector<1x128xf32>
    %54 = arith.mulf %49, %49 : vector<8x128xf32>
    %cst_24 = arith.constant dense<0.000000e+00> : vector<128xf32>
    %55 = vector.multi_reduction <add>, %54, %cst_24 [0] : vector<8x128xf32> to vector<128xf32>
    %56 = vector.shape_cast %55 : vector<128xf32> to vector<1x128xf32>
    %cst_25 = arith.constant 8.000000e+00 : f32
    %57 = vector.broadcast %cst_25 : f32 to vector<1x128xf32>
    %58 = arith.divf %56, %57 : vector<1x128xf32>
    %59 = arith.mulf %53, %53 : vector<1x128xf32>
    %60 = arith.subf %58, %59 : vector<1x128xf32>
    %cst_26 = arith.constant 0.000000e+00 : f32
    %61 = vector.broadcast %cst_26 : f32 to vector<1x128xf32>
    %62 = arith.maximumf %60, %61 : vector<1x128xf32>
    %63 = vector.broadcast %53 : vector<1x128xf32> to vector<8x128xf32>
    %64 = arith.subf %49, %63 : vector<8x128xf32>
    %cst_27 = arith.constant 9.99999974E-6 : f32
    %65 = vector.broadcast %cst_27 : f32 to vector<1x128xf32>
    %66 = arith.addf %62, %65 : vector<1x128xf32>
    %67 = math.rsqrt %66 : vector<1x128xf32>
    %68 = vector.broadcast %67 : vector<1x128xf32> to vector<8x128xf32>
    %69 = arith.mulf %64, %68 : vector<8x128xf32>
    %70 = math.tanh %69 : vector<8x128xf32>
    %c0_28 = arith.constant 0 : index
    %c0_29 = arith.constant 0 : index
    %71 = vector.load %arg5[%c0_28, %c0_29] : memref<128x128xf32, #tpu.memory_space<vmem>>, vector<128x128xf32>
    %cst_30 = arith.constant dense<0.000000e+00> : vector<8x128xf32>
    %72 = tpu.matmul %70, %71, %cst_30 {dimension_numbers = #tpu.dot_dimension_numbers<[1], [0], [0], [1], [0, 0, 1, 1], [], []>} : vector<8x128xf32>, vector<128x128xf32>, vector<8x128xf32> -> vector<8x128xf32>
    %c0_31 = arith.constant 0 : index
    %c0_32 = arith.constant 0 : index
    %73 = vector.load %arg6[%c0_31, %c0_32] : memref<1x128xf32, #tpu.memory_space<vmem>>, vector<1x128xf32>
    %74 = vector.broadcast %73 : vector<1x128xf32> to vector<8x128xf32>
    %75 = arith.addf %72, %74 : vector<8x128xf32>
    %c0_33 = arith.constant 0 : index
    %c0_34 = arith.constant 0 : index
    %c0_35 = arith.constant 0 : index
    %76 = vector.load %arg7[%c0_33, %c0_34, %c0_35] : memref<1x8x128xf32, #tpu.memory_space<vmem>>, vector<1x8x128xf32>
    %77 = vector.shape_cast %76 : vector<1x8x128xf32> to vector<8x128xf32>
    %78 = vector.shape_cast %75 : vector<8x128xf32> to vector<1x8x128xf32>
    tpu.vector_store %arg7[%c0_33, %c0_34, %c0_35], %78 {strides = array<i32>} : memref<1x8x128xf32, #tpu.memory_space<vmem>>, vector<1x8x128xf32>,
    return
  }
  func.func @transform_0(%arg0: i32) -> (i32, i32, i32) {
    %c0_i32 = arith.constant 0 : i32
    %c0_i32_0 = arith.constant 0 : i32
    %c0_i32_1 = arith.constant 0 : i32
    return %arg0, %c0_i32, %c0_i32_0 : i32, i32, i32
  }
  func.func @transform_1(%arg0: i32) -> (i32, i32) {
    %c0_i32 = arith.constant 0 : i32
    %c0_i32_0 = arith.constant 0 : i32
    %c0_i32_1 = arith.constant 0 : i32
    return %c0_i32, %c0_i32_0 : i32, i32
  }
  func.func @transform_2(%arg0: i32) -> (i32, i32) {
    %c0_i32 = arith.constant 0 : i32
    %c0_i32_0 = arith.constant 0 : i32
    %c0_i32_1 = arith.constant 0 : i32
    return %c0_i32, %c0_i32_0 : i32, i32
  }
  func.func @transform_3(%arg0: i32) -> (i32, i32) {
    %c0_i32 = arith.constant 0 : i32
    %c0_i32_0 = arith.constant 0 : i32
    %c0_i32_1 = arith.constant 0 : i32
    return %c0_i32, %c0_i32_0 : i32, i32
  }
  func.func @transform_4(%arg0: i32) -> (i32, i32) {
    %c0_i32 = arith.constant 0 : i32
    %c0_i32_0 = arith.constant 0 : i32
    %c0_i32_1 = arith.constant 0 : i32
    return %c0_i32, %c0_i32_0 : i32, i32
  }
  func.func @transform_5(%arg0: i32) -> (i32, i32) {
    %c0_i32 = arith.constant 0 : i32
    %c0_i32_0 = arith.constant 0 : i32
    %c0_i32_1 = arith.constant 0 : i32
    return %c0_i32, %c0_i32_0 : i32, i32
  }
  func.func @transform_6(%arg0: i32) -> (i32, i32, i32) {
    %c0_i32 = arith.constant 0 : i32
    %c0_i32_0 = arith.constant 0 : i32
    %c0_i32_1 = arith.constant 0 : i32
    return %arg0, %c0_i32, %c0_i32_0 : i32, i32, i32
  }
}

</mosaic_0001>

<bundles_post_ra>
// kernel: mlp_forward_stacked.1
= control target key start
LH: loop header
LB: loop body
LE: loop exit
PB: predicated region body
PF: predicated region fallthrough
CT: control target
= control target key end

     0   :  { %11 = vsyncpa [#allocation3], 0  ;;  %s949_s0 = inlined_call_operand.vmem [shape: f32[1,8,8], index: 0, kind: input, shape index: {}]   ;;  %s950_s1 = inlined_call_operand.vmem [shape: f32[8,128], index: 1, kind: input, shape index: {}]   ;;  %s951_s2 = inlined_call_operand.hbm [shape: f32[128,128], index: 2, kind: input, shape index: {}]   ;;  %s952_s3 = inlined_call_operand.hbm [shape: f32[128,128], index: 3, kind: input, shape index: {}]   ;;  %s953_s4 = inlined_call_operand.hbm [shape: f32[128,128], index: 4, kind: input, shape index: {}]   ;;  %s954_s5 = inlined_call_operand.vmem [shape: f32[1,128], index: 5, kind: input, shape index: {}]   ;;  %s955_s6 = inlined_call_operand.vmem [shape: f32[1,8,128], index: 6, kind: output, shape index: {}]  }
   0x1   :  { %12 = vsyncpa [#allocation5], 0  ;;  %s809_s21 = smov [#allocation4]   ;;  %s810_s23 = smov [#allocation2]  }
   0x2   :  { %s34_s22 = sshll.u32 %s809_s21, 4  ;;  %s22_s24 = sshll.u32 %s810_s23, 4  ;;  %s35_s22 = int_to_ptr.vmem [resolvable:$true] %s34_s22  ;;  %s852_s24 = int_to_ptr.vmem [resolvable:$true] %s22_s24 }
   0x3   :  { %s739_s27 = scalar_lea.hbm %s952_s3, 2048 }
   0x4   :  { %p740_p0 = scmp.ne.s32.totalorder %s952_s3, %s739_s27  ;;  %p743_p1 = scmp.lt.u32.totalorder %s739_s27, %s952_s3 }
   0x6   :  { %p745_p2 = pnand %p743_p1, %p740_p0 }
   0x8   :  { %748 = shalt.err (!%p745_p2)
}
   0x9   :  { %s749_s8 = scalar_lea.vmem %s35_s22, 2048  ;;  %p754_p4 = scmp.lt.s32.totalorder %s35_s22, %s35_s22 }
   0xa   :  { %p750_p3 = scmp.ne.s32.totalorder %s35_s22, %s749_s8  ;;  %p755_p5 = scmp.lt.s32.totalorder %s749_s8, %s749_s8 }
   0xc   :  { %p756_p6 = por %p755_p5, %p754_p4 }
   0xe   :  { %p757_p7 = pnand %p756_p6, %p750_p3 }
  0x10   :  { %760 = shalt.err (!%p757_p7)
}
  0x11   :  { %s811_s9 = smov 128   ;;  %s812_s10 = smov 8  }
  0x12   :  { %40 = dma.hbm_to_vmem [thread:$0]  %s952_s3, 2048, %s35_s22, [#allocation5], %s811_s9, %s811_s9, %s812_s10  }
  0x13   :  { %s761_s15 = scalar_lea.hbm %s951_s2, 2048 }
  0x14   :  { %p762_p8 = scmp.ne.s32.totalorder %s951_s2, %s761_s15  ;;  %p765_p9 = scmp.lt.u32.totalorder %s761_s15, %s951_s2 }
  0x16   :  { %p767_p10 = pnand %p765_p9, %p762_p8 }
  0x18   :  { %770 = shalt.err (!%p767_p10)
}
  0x19   :  { %s771_s20 = scalar_lea.vmem %s852_s24, 2048  ;;  %p776_p12 = scmp.lt.s32.totalorder %s852_s24, %s852_s24 }
  0x1a   :  { %p772_p11 = scmp.ne.s32.totalorder %s852_s24, %s771_s20  ;;  %p777_p13 = scmp.lt.s32.totalorder %s771_s20, %s771_s20 }
  0x1c   :  { %p778_p0 = por %p777_p13, %p776_p12 }
  0x1e   :  { %p779_p1 = pnand %p778_p0, %p772_p11 }
  0x20   :  { %782 = shalt.err (!%p779_p1)
}
  0x21   :  { %28 = dma.hbm_to_vmem [thread:$0]  %s951_s2, 2048, %s852_s24, [#allocation3], %s811_s9, %s811_s9, %s812_s10  }
  0x22   :  { %s813_s22 = smov [#allocation6]   ;;  %s783_s27 = scalar_lea.hbm %s953_s4, 2048 }
  0x23   :  { %s46_s23 = sshll.u32 %s813_s22, 4  ;;  %p784_p2 = scmp.ne.s32.totalorder %s953_s4, %s783_s27  ;;  %s47_s23 = int_to_ptr.vmem [resolvable:$true] %s46_s23 }
  0x24   :  { %p787_p3 = scmp.lt.u32.totalorder %s783_s27, %s953_s4 }
  0x26   :  { %p789_p4 = pnand %p787_p3, %p784_p2 }
  0x28   :  { %792 = shalt.err (!%p789_p4)
}
  0x29   :  { %s793_s8 = scalar_lea.vmem %s47_s23, 2048  ;;  %p798_p6 = scmp.lt.s32.totalorder %s47_s23, %s47_s23 }
  0x2a   :  { %p794_p5 = scmp.ne.s32.totalorder %s47_s23, %s793_s8  ;;  %p799_p7 = scmp.lt.s32.totalorder %s793_s8, %s793_s8 }
  0x2c   :  { %p800_p8 = por %p799_p7, %p798_p6 }
  0x2e   :  { %p801_p9 = pnand %p800_p8, %p794_p5 }
  0x30   :  { %804 = shalt.err (!%p801_p9)
}
  0x31   :  { %52 = dma.hbm_to_vmem [thread:$0]  %s953_s4, 2048, %s47_s23, [#allocation5], %s811_s9, %s811_s9, %s812_s10  }
  0x32   :  { %805 = dma.done.wait [#allocation3], 2048  }
  0x33   :  { %806 = vsyncadd [#allocation3], 4294965248 }
  0x34   :  { %807 = dma.done.wait [#allocation5], 4096  }
  0x35   :  { %808 = vsyncadd [#allocation5], 4294963200  ;;  %v814_v0 = vmov 0.0   ;;  %vm815_vm0 = vmmov 0   ;;  %vm66_vm1 = vcmask 64512   ;;  %v65_v1 = vld [vmem:[%s950_s1] sm:$0xff] }
  0x36   :  { %537 = vmatprep.subr.mxu0 %v814_v0  ;;  %539 = vmatprep.mubr.msk.f32.mxu0 %vm815_vm0, %v814_v0  ;;  %v64_v2 = vld [vmem:[%s949_s0] sm:$0xff]  ;;  %v165_v4 = vld [vmem:[#allocation2 + $0x8] sm:$0xff]  ;;  %v816_v6 = vmov 0.0|0.0   ;;  %v166_v7 = vld [vmem:[#allocation2 + $0x10] sm:$0xff] }
  0x37   :  { %574 = vmatprep.mubr.msk.f32.mxu1 %vm815_vm0, %v814_v0  ;;  %538 = vmatpush3.msra.mxu0 %v65_v1  ;;  %v164_v3 = vld [vmem:[#allocation2] sm:$0xff]  ;;  %v167_v8 = vld [vmem:[#allocation2 + $0x18] sm:$0xff]  ;;  %v169_v11 = vld [vmem:[#allocation2 + $0x28] sm:$0xff] }
  0x38   :  { %540 = vmatmul.mubr.msk.f32.vlgmr.msra.gmra.mrb[0].mxu0 %vm66_vm1, %v64_v2  ;;  %v648_v5 = vpack.c.bf16 %v165_v4, %v164_v3  ;;  %647 = vmatprep.subr.bf16.mxu1 %v816_v6  ;;  %v651_v9 = vpack.c.bf16 %v167_v8, %v166_v7  ;;  %v168_v10 = vld [vmem:[#allocation2 + $0x20] sm:$0xff]  ;;  %v170_v13 = vld [vmem:[#allocation2 + $0x30] sm:$0xff]  ;;  %v171_v14 = vld [vmem:[#allocation2 + $0x38] sm:$0xff] }
  0x39   :  { %609 = vmatprep.mubr.msk.f32.mxu0 %vm815_vm0, %v814_v0  ;;  %671 = vmatprep.subr.bf16.mxu0 %v816_v6  ;;  %v654_v12 = vpack.c.bf16 %v169_v11, %v168_v10  ;;  %v657_v15 = vpack.c.bf16 %v171_v14, %v170_v13  ;;  %v172_v16 = vld [vmem:[#allocation2 + $0x40] sm:$0xff]  ;;  %v173_v17 = vld [vmem:[#allocation2 + $0x48] sm:$0xff]  ;;  %v174_v19 = vld [vmem:[#allocation2 + $0x50] sm:$0xff] }
  0x3a   :  { %649 = vmatpush3.bf16.msra.mxu1 %v648_v5  ;;  %v660_v18 = vpack.c.bf16 %v173_v17, %v172_v16  ;;  %v175_v20 = vld [vmem:[#allocation2 + $0x58] sm:$0xff]  ;;  %v176_v22 = vld [vmem:[#allocation2 + $0x60] sm:$0xff]  ;;  %v177_v23 = vld [vmem:[#allocation2 + $0x68] sm:$0xff] }
  0x3b   :  { %650 = vmatprep.subr.bf16.mxu1 %v816_v6  ;;  %v663_v21 = vpack.c.bf16 %v175_v20, %v174_v19  ;;  %v666_v24 = vpack.c.bf16 %v177_v23, %v176_v22  ;;  %v178_v25 = vld [vmem:[#allocation2 + $0x70] sm:$0xff]  ;;  %v179_v26 = vld [vmem:[#allocation2 + $0x78] sm:$0xff]  ;;  %v273_v53 = vld [vmem:[#allocation4] sm:$0xff] }
  0x3c   :  { %v669_v27 = vpack.c.bf16 %v179_v26, %v178_v25  ;;  %v274_v54 = vld [vmem:[#allocation4 + $0x8] sm:$0xff]  ;;  %v275_v56 = vld [vmem:[#allocation4 + $0x10] sm:$0xff]  ;;  %v276_v57 = vld [vmem:[#allocation4 + $0x18] sm:$0xff] }
  0x3d   :  { %v672_v55 = vpack.c.bf16 %v274_v54, %v273_v53  ;;  %v675_v58 = vpack.c.bf16 %v276_v57, %v275_v56  ;;  %v277_v59 = vld [vmem:[#allocation4 + $0x20] sm:$0xff]  ;;  %v278_v60 = vld [vmem:[#allocation4 + $0x28] sm:$0xff]  ;;  %v279_v62 = vld [vmem:[#allocation4 + $0x30] sm:$0xff] }
  0x3e   :  { %652 = vmatpush3.bf16.msra.mxu1 %v651_v9  ;;  %v678_v61 = vpack.c.bf16 %v278_v60, %v277_v59  ;;  %v280_v63 = vld [vmem:[#allocation4 + $0x38] sm:$0xff]  ;;  %v281_v1 = vld [vmem:[#allocation4 + $0x40] sm:$0xff]  ;;  %v282_v2 = vld [vmem:[#allocation4 + $0x48] sm:$0xff] }
  0x3f   :  { %653 = vmatprep.subr.bf16.mxu1 %v816_v6  ;;  %673 = vmatpush3.bf16.msra.mxu0 %v672_v55  ;;  %v684_v3 = vpack.c.bf16 %v282_v2, %v281_v1  ;;  %v283_v4 = vld [vmem:[#allocation4 + $0x50] sm:$0xff]  ;;  %v284_v5 = vld [vmem:[#allocation4 + $0x58] sm:$0xff]  ;;  %v285_v8 = vld [vmem:[#allocation4 + $0x60] sm:$0xff] }
  0x40   :  { %674 = vmatprep.subr.bf16.mxu0 %v816_v6  ;;  %v687_v7 = vpack.c.bf16 %v284_v5, %v283_v4  ;;  %v286_v9 = vld [vmem:[#allocation4 + $0x68] sm:$0xff]  ;;  %v287_v11 = vld [vmem:[#allocation4 + $0x70] sm:$0xff]  ;;  %v393_v55 = vld [vmem:[#allocation6 + $0x58] sm:$0xff] }
  0x41   :  { %v690_v10 = vpack.c.bf16 %v286_v9, %v285_v8  ;;  %v392_v54 = vld [vmem:[#allocation6 + $0x50] sm:$0xff]  ;;  %v394_v57 = vld [vmem:[#allocation6 + $0x60] sm:$0xff] }
  0x42   :  { %655 = vmatpush3.bf16.msra.mxu1 %v654_v12  ;;  %v288_v12 = vld [vmem:[#allocation4 + $0x78] sm:$0xff]  ;;  %v711_v56 = vpack.c.bf16 %v393_v55, %v392_v54  ;;  %v396_v60 = vld [vmem:[#allocation6 + $0x70] sm:$0xff] }
  0x43   :  { %656 = vmatprep.subr.bf16.mxu1 %v816_v6  ;;  %676 = vmatpush3.bf16.msra.mxu0 %v675_v58  ;;  %v693_v13 = vpack.c.bf16 %v288_v12, %v287_v11  ;;  %v395_v58 = vld [vmem:[#allocation6 + $0x68] sm:$0xff] }
  0x44   :  { %677 = vmatprep.subr.bf16.mxu0 %v816_v6  ;;  %v714_v59 = vpack.c.bf16 %v395_v58, %v394_v57 }
  0x46   :  { %658 = vmatpush3.bf16.msra.mxu1 %v657_v15 }
  0x47   :  { %659 = vmatprep.subr.bf16.mxu1 %v816_v6  ;;  %679 = vmatpush3.bf16.msra.mxu0 %v678_v61  ;;  %v397_v61 = vld [vmem:[#allocation6 + $0x78] sm:$0xff] }
  0x48   :  { %680 = vmatprep.subr.bf16.mxu0 %v816_v6 }
  0x4a   :  { %661 = vmatpush3.bf16.msra.mxu1 %v660_v18 }
  0x4b   :  { %662 = vmatprep.subr.bf16.mxu1 %v816_v6 }
  0x4e   :  { %664 = vmatpush3.bf16.msra.mxu1 %v663_v21 }
  0x4f   :  { %665 = vmatprep.subr.bf16.mxu1 %v816_v6 }
  0x52   :  { %667 = vmatpush3.bf16.msra.mxu1 %v666_v24 }
  0x53   :  { %668 = vmatprep.subr.bf16.mxu1 %v816_v6 }
  0x56   :  { %670 = vmatpush3.bf16.msra.mxu1 %v669_v27 }
  0x57   :  { %695 = vmatprep.subr.bf16.mxu1 %v816_v6 }
 0x10b   :  { %v136_v28 = vpop.f32.mrb[0].mxu0 }
 0x10c   :  { %v140_v29 = vrot.slane %v136_v28, 4  ;;  %v148_v30 = vmul.f32 %v136_v28, %v136_v28  ;;  %v541_v31 = vpop.f32.mrb[1].mxu0 }
 0x10e   :  { %v141_v32 = vadd.f32 %v140_v29, %v136_v28  ;;  %v149_v33 = vrot.slane %v148_v30, 4 }
 0x110   :  { %v142_v34 = vrot.slane %v141_v32, 2  ;;  %v150_v35 = vadd.f32 %v149_v33, %v148_v30 }
 0x112   :  { %v143_v36 = vadd.f32 %v142_v34, %v141_v32  ;;  %v151_v37 = vrot.slane %v150_v35, 2 }
 0x114   :  { %v144_v38 = vrot.slane %v143_v36, 1  ;;  %v152_v39 = vadd.f32 %v151_v37, %v150_v35 }
 0x116   :  { %v145_v40 = vadd.f32 %v144_v38, %v143_v36  ;;  %v153_v41 = vrot.slane %v152_v39, 1 }
 0x118   :  { %v147_v42 = vmul.f32 0.125, %v145_v40  ;;  %v154_v43 = vadd.f32 %v153_v41, %v152_v39  ;;  %v382_v39 = vld [vmem:[#allocation6] sm:$0xff]  ;;  %v383_v40 = vld [vmem:[#allocation6 + $0x8] sm:$0xff] }
 0x119   :  { %v696_v41 = vpack.c.bf16 %v383_v40, %v382_v39 }
 0x11a   :  { %v155_v44 = vmul.f32 0.125, %v154_v43  ;;  %v156_v45 = vmul.f32 %v147_v42, %v147_v42  ;;  %v159_v49 = vsub.f32 %v136_v28, %v147_v42  ;;  %v384_v42 = vld [vmem:[#allocation6 + $0x10] sm:$0xff]  ;;  %v385_v43 = vld [vmem:[#allocation6 + $0x18] sm:$0xff] }
 0x11c   :  { %v157_v46 = vsub.f32 %v155_v44, %v156_v45  ;;  %v699_v44 = vpack.c.bf16 %v385_v43, %v384_v42  ;;  %v386_v45 = vld [vmem:[#allocation6 + $0x20] sm:$0xff] }
 0x11e   :  { %v158_v47 = vmax.f32 %v157_v46, 0.0  ;;  %v387_v46 = vld [vmem:[#allocation6 + $0x28] sm:$0xff] }
 0x120   :  { %v160_v48 = vadd.f32 1e-05, %v158_v47  ;;  %v702_v47 = vpack.c.bf16 %v387_v46, %v386_v45 }
 0x122   :  { %727 = vrsqrt.f32 %v160_v48  ;;  %v388_v48 = vld [vmem:[#allocation6 + $0x30] sm:$0xff] }
 0x12c   :  { %v728_v50 = vpop.eup %727 }
 0x12d   :  { %v162_v51 = vmul.f32 %v728_v50, %v159_v49  ;;  %v389_v49 = vld [vmem:[#allocation6 + $0x38] sm:$0xff] }
 0x12e   :  { %v705_v50 = vpack.c.bf16 %v389_v49, %v388_v48 }
 0x12f   :  { %729 = vtanh.f32 %v162_v51  ;;  %v390_v51 = vld [vmem:[#allocation6 + $0x40] sm:$0xff] }
 0x139   :  { %v730_v52 = vpop.eup %729 }
 0x13a   :  { %575 = vmatmul.mubr.f32.vlgmr.msra.gmra.mrb[0].mxu1 %v730_v52  ;;  %v391_v52 = vld [vmem:[#allocation6 + $0x48] sm:$0xff] }
 0x13b   :  { %644 = vmatprep.mubr.msk.f32.mxu1 %vm815_vm0, %v814_v0  ;;  %v681_v0 = vpack.c.bf16 %v280_v63, %v279_v62  ;;  %697 = vmatpush3.bf16.msra.mxu1 %v696_v41  ;;  %v708_v53 = vpack.c.bf16 %v391_v52, %v390_v51  ;;  %v717_v62 = vpack.c.bf16 %v397_v61, %v396_v60 }
 0x13c   :  { %698 = vmatprep.subr.bf16.mxu1 %v816_v6 }
 0x13d   :  { %682 = vmatpush3.bf16.msra.mxu0 %v681_v0 }
 0x13e   :  { %683 = vmatprep.subr.bf16.mxu0 %v816_v6 }
 0x13f   :  { %700 = vmatpush3.bf16.msra.mxu1 %v699_v44 }
 0x140   :  { %701 = vmatprep.subr.bf16.mxu1 %v816_v6 }
 0x141   :  { %685 = vmatpush3.bf16.msra.mxu0 %v684_v3 }
 0x142   :  { %686 = vmatprep.subr.bf16.mxu0 %v816_v6 }
 0x143   :  { %703 = vmatpush3.bf16.msra.mxu1 %v702_v47 }
 0x144   :  { %704 = vmatprep.subr.bf16.mxu1 %v816_v6 }
 0x145   :  { %688 = vmatpush3.bf16.msra.mxu0 %v687_v7 }
 0x146   :  { %689 = vmatprep.subr.bf16.mxu0 %v816_v6 }
 0x147   :  { %706 = vmatpush3.bf16.msra.mxu1 %v705_v50 }
 0x148   :  { %707 = vmatprep.subr.bf16.mxu1 %v816_v6 }
 0x149   :  { %691 = vmatpush3.bf16.msra.mxu0 %v690_v10 }
 0x14a   :  { %692 = vmatprep.subr.bf16.mxu0 %v816_v6 }
 0x14b   :  { %709 = vmatpush3.bf16.msra.mxu1 %v708_v53 }
 0x14c   :  { %710 = vmatprep.subr.bf16.mxu1 %v816_v6 }
 0x14d   :  { %694 = vmatpush3.bf16.msra.mxu0 %v693_v13 }
 0x14f   :  { %712 = vmatpush3.bf16.msra.mxu1 %v711_v56 }
 0x150   :  { %713 = vmatprep.subr.bf16.mxu1 %v816_v6 }
 0x153   :  { %715 = vmatpush3.bf16.msra.mxu1 %v714_v59 }
 0x154   :  { %716 = vmatprep.subr.bf16.mxu1 %v816_v6 }
 0x157   :  { %718 = vmatpush3.bf16.msra.mxu1 %v717_v62 }
 0x20d   :  { %v246_v14 = vpop.f32.mrb[0].mxu1 }
 0x20e   :  { %v250_v15 = vrot.slane %v246_v14, 4  ;;  %v257_v16 = vmul.f32 %v246_v14, %v246_v14  ;;  %v576_v17 = vpop.f32.mrb[1].mxu1 }
 0x210   :  { %v251_v18 = vadd.f32 %v250_v15, %v246_v14  ;;  %v258_v19 = vrot.slane %v257_v16, 4 }
 0x212   :  { %v252_v20 = vrot.slane %v251_v18, 2  ;;  %v259_v21 = vadd.f32 %v258_v19, %v257_v16 }
 0x214   :  { %v253_v22 = vadd.f32 %v252_v20, %v251_v18  ;;  %v260_v23 = vrot.slane %v259_v21, 2 }
 0x216   :  { %v254_v24 = vrot.slane %v253_v22, 1  ;;  %v261_v25 = vadd.f32 %v260_v23, %v259_v21 }
 0x218   :  { %v255_v26 = vadd.f32 %v254_v24, %v253_v22  ;;  %v262_v27 = vrot.slane %v261_v25, 1  ;;  %v483_v24 = vld [vmem:[%s954_s5] ss:$0 sm:$0xff] }
 0x21a   :  { %v256_v28 = vmul.f32 0.125, %v255_v26  ;;  %v263_v29 = vadd.f32 %v262_v27, %v261_v25 }
 0x21c   :  { %v264_v30 = vmul.f32 0.125, %v263_v29  ;;  %v265_v31 = vmul.f32 %v256_v28, %v256_v28  ;;  %v268_v35 = vsub.f32 %v246_v14, %v256_v28 }
 0x21e   :  { %v266_v32 = vsub.f32 %v264_v30, %v265_v31 }
 0x220   :  { %v267_v33 = vmax.f32 %v266_v32, 0.0 }
 0x222   :  { %v269_v34 = vadd.f32 1e-05, %v267_v33 }
 0x224   :  { %731 = vrsqrt.f32 %v269_v34 }
 0x22e   :  { %v732_v36 = vpop.eup %731 }
 0x22f   :  { %v271_v37 = vmul.f32 %v732_v36, %v268_v35 }
 0x231   :  { %733 = vtanh.f32 %v271_v37 }
 0x23b   :  { %v734_v38 = vpop.eup %733 }
 0x23c   :  { %610 = vmatmul.mubr.f32.vlgmr.msra.gmra.mrb[2].mxu0 %v734_v38 }
 0x30f   :  { %v355_v63 = vpop.f32.mrb[2].mxu0 }
 0x310   :  { %v359_v0 = vrot.slane %v355_v63, 4  ;;  %v366_v1 = vmul.f32 %v355_v63, %v355_v63  ;;  %v611_v2 = vpop.f32.mrb[3].mxu0 }
 0x312   :  { %v360_v3 = vadd.f32 %v359_v0, %v355_v63  ;;  %v367_v4 = vrot.slane %v366_v1, 4 }
 0x314   :  { %v361_v5 = vrot.slane %v360_v3, 2  ;;  %v368_v7 = vadd.f32 %v367_v4, %v366_v1 }
 0x316   :  { %v362_v8 = vadd.f32 %v361_v5, %v360_v3  ;;  %v369_v9 = vrot.slane %v368_v7, 2 }
 0x318   :  { %v363_v10 = vrot.slane %v362_v8, 1  ;;  %v370_v11 = vadd.f32 %v369_v9, %v368_v7 }
 0x31a   :  { %v364_v12 = vadd.f32 %v363_v10, %v362_v8  ;;  %v371_v13 = vrot.slane %v370_v11, 1 }
 0x31c   :  { %v365_v14 = vmul.f32 0.125, %v364_v12  ;;  %v372_v15 = vadd.f32 %v371_v13, %v370_v11 }
 0x31e   :  { %v373_v16 = vmul.f32 0.125, %v372_v15  ;;  %v374_v17 = vmul.f32 %v365_v14, %v365_v14  ;;  %v377_v20 = vsub.f32 %v355_v63, %v365_v14 }
 0x320   :  { %v375_v6 = vsub.f32 %v373_v16, %v374_v17 }
 0x322   :  { %v376_v18 = vmax.f32 %v375_v6, 0.0 }
 0x324   :  { %v378_v19 = vadd.f32 1e-05, %v376_v18 }
 0x326   :  { %735 = vrsqrt.f32 %v378_v19 }
 0x330   :  { %v736_v21 = vpop.eup %735 }
 0x331   :  { %v380_v22 = vmul.f32 %v736_v21, %v377_v20 }
 0x333   :  { %737 = vtanh.f32 %v380_v22 }
 0x33d   :  { %v738_v23 = vpop.eup %737 }
 0x33e   :  { %645 = vmatmul.mubr.f32.vlgmr.msra.gmra.mrb[2].mxu1 %v738_v23 }
 0x411   :  { %v471_v25 = vpop.f32.mrb[2].mxu1 }
 0x412   :  { %v472_v26 = vadd.f32 %v483_v24, %v471_v25  ;;  %v646_v27 = vpop.f32.mrb[3].mxu1 }
 0x414   :  { %475 = vst [vmem:[%s955_s6] sm:$0xff] %v472_v26 }
 0x415   :  { %480 = vsyncpa [#allocation3], 1 }
 0x416   :  { %481 = vsyncpa [#allocation5], 1 }

</bundles_post_ra>
